<compile_context>
chip_gen: v7x
topology: tpu7x:2x2x1
jax: 0.10.0
libtpu: 0.0.40
codegen_flags: <defaults>
</compile_context>

<pallas_src>
import functools

import jax
import jax.numpy as jnp
from jax import lax
from jax.experimental import pallas as pl
from jax.experimental.pallas import tpu as pltpu


def _dsconv_kernel(x_ref, wpl_ref, pww_ref, pwb_ref, o_ref, *, shifts):
    # x_ref  : (1, C_in, HW)      one sample, flattened spatial plane (lane-dense)
    # wpl_ref: (9, C_in, HW)      masked, pre-broadcast depthwise weight planes
    # pww_ref: (C_out, C_in)      pointwise weights
    # pwb_ref: (C_out, 1)         effective bias (pw_b + pw_w @ dw_b)
    # o_ref  : (1, C_out, HW)
    # shifts : static tuple of 9 lane-roll amounts (one per 3x3 tap)
    x = x_ref[0].astype(jnp.float32)                # (C_in, HW)

    # Depthwise 3x3: 9 lane rotations (XLU) + mul/add (VPU).  Border handling
    # is already baked into the weight planes, so there is no select and no
    # broadcast in the loop.
    acc = None
    for t in range(9):
        s = shifts[t]
        xt = x if s == 0 else pltpu.roll(x, shift=s, axis=1)
        term = wpl_ref[t] * xt                      # (C_in, HW)
        acc = term if acc is None else acc + term

    # Pointwise 1x1: lane-dense (C_out, C_in) x (C_in, HW) MXU matmul.
    out = jnp.dot(pww_ref[...], acc, preferred_element_type=jnp.float32)
    out = out + pwb_ref[...]
    o_ref[0] = out.astype(o_ref.dtype)


def depthwise_separable_conv3(x, dw_w, dw_b, pw_w, pw_b):
    """x: (N, C_in, H, W) f32; dw_w: (C_in, 3, 3); dw_b: (C_in,);
    pw_w: (C_out, C_in); pw_b: (C_out,).  Returns (N, C_out, H, W)."""
    N, C_in, H, W = x.shape
    C_out = pw_w.shape[0]
    HW = H * W

    x_flat = x.reshape(N, C_in, HW)                 # layout-preserving view

    # --- Host-side precompute -------------------------------------------------
    # Border-validity masks for the 9 taps of the flattened (roll-based) stencil.
    lane = jnp.arange(HW, dtype=jnp.int32)
    row = lane // W
    col = lane % W
    ones = jnp.ones((HW,), jnp.float32)
    row_ok = {-1: (row >= 1).astype(jnp.float32), 0: ones,
              1: (row <= H - 2).astype(jnp.float32)}
    col_ok = {-1: (col >= 1).astype(jnp.float32), 0: ones,
              1: (col <= W - 2).astype(jnp.float32)}

    planes = []
    shifts = []
    for di in range(3):
        for dj in range(3):
            ddi, ddj = di - 1, dj - 1
            mask = row_ok[ddi] * col_ok[ddj]                      # (HW,)
            planes.append(dw_w[:, di, dj][:, None].astype(jnp.float32)
                          * mask[None, :])                        # (C_in, HW)
            shifts.append((-(ddi * W + ddj)) % HW)                # lane roll
    wplanes = jnp.stack(planes, axis=0)                           # (9, C_in, HW)
    shifts = tuple(int(s) for s in shifts)

    # Fold depthwise bias into the pointwise bias (exact up to fp reassociation).
    pwb_eff = (pw_b + pw_w @ dw_b).reshape(C_out, 1).astype(jnp.float32)
    pww = pw_w.astype(jnp.float32)

    # --- VMEM budget / compiler params -----------------------------------------
    bpe = 4  # f32
    x_blk = C_in * HW * bpe
    o_blk = C_out * HW * bpe
    w_blk = (9 * C_in * HW + C_out * C_in + C_out) * bpe
    # Conservative: double-buffer everything, plus headroom for scratch/layout.
    needed = 2 * (x_blk + o_blk + w_blk)
    vmem_limit = int(min(max(4 * needed, 32 * 1024 * 1024), 64 * 1024 * 1024))
    # NOTE: if a single-sample block ever exceeds the per-buffer budget
    # (huge H*W), add a row-block grid axis with halo rows instead of
    # growing vmem_limit further.

    grid_spec = pltpu.PrefetchScalarGridSpec(
        num_scalar_prefetch=0,
        grid=(N,),
        in_specs=[
            pl.BlockSpec((1, C_in, HW), lambda n: (n, 0, 0)),
            pl.BlockSpec((9, C_in, HW), lambda n: (0, 0, 0)),   # fetched once
            pl.BlockSpec((C_out, C_in), lambda n: (0, 0)),      # fetched once
            pl.BlockSpec((C_out, 1), lambda n: (0, 0)),         # fetched once
        ],
        out_specs=pl.BlockSpec((1, C_out, HW), lambda n: (n, 0, 0)),
    )

    out = pl.pallas_call(
        functools.partial(_dsconv_kernel, shifts=shifts),
        out_shape=jax.ShapeDtypeStruct((N, C_out, HW), x.dtype),
        grid_spec=grid_spec,
        compiler_params=pltpu.CompilerParams(
            dimension_semantics=("parallel",),
            vmem_limit_bytes=vmem_limit),
    )(x_flat, wplanes, pww, pwb_eff)

    return out.reshape(N, C_out, H, W)


def _reference(x, dw_w, dw_b, pw_w, pw_b):
    """Pure-JAX reference matching nn.Conv2d semantics (NCHW)."""
    C_in = x.shape[1]
    y = lax.conv_general_dilated(
        x, dw_w.reshape(C_in, 1, 3, 3),
        window_strides=(1, 1), padding=((1, 1), (1, 1)),
        dimension_numbers=("NCHW", "OIHW", "NCHW"),
        feature_group_count=C_in)
    y = y + dw_b.reshape(1, C_in, 1, 1)
    z = lax.conv_general_dilated(
        y, pw_w[:, :, None, None],
        window_strides=(1, 1), padding=((0, 0), (0, 0)),
        dimension_numbers=("NCHW", "OIHW", "NCHW"))
    return z + pw_b.reshape(1, -1, 1, 1)


if __name__ == "__main__":
    N, C_in, C_out, H, W = 2, 4, 8, 16, 16

    key = jax.random.PRNGKey(0)
    kx, k1, k2, k3, k4 = jax.random.split(key, 5)

    x = jax.random.normal(kx, (N, C_in, H, W), dtype=jnp.float32)

    # Deterministic parameter init (uniform, PyTorch-like fan-in bounds).
    b_dw = 1.0 / 3.0                   # 1/sqrt(1*3*3)
    dw_w = jax.random.uniform(k1, (C_in, 3, 3), jnp.float32, -b_dw, b_dw)
    dw_b = jax.random.uniform(k2, (C_in,), jnp.float32, -b_dw, b_dw)
    b_pw = 1.0 / (C_in ** 0.5)         # 1/sqrt(C_in*1*1)
    pw_w = jax.random.uniform(k3, (C_out, C_in), jnp.float32, -b_pw, b_pw)
    pw_b = jax.random.uniform(k4, (C_out,), jnp.float32, -b_pw, b_pw)

    out = depthwise_separable_conv3(x, dw_w, dw_b, pw_w, pw_b)
    out = jax.block_until_ready(out)

    ref = _reference(x, dw_w, dw_b, pw_w, pw_b)
    assert out.shape == (N, C_out, H, W)
    assert jnp.allclose(out, ref, atol=1e-4, rtol=1e-4)

    print("KERNEL_OK")
</pallas_src>

<mosaic_0001>
module attributes {stable_mosaic.version = 11 : i64} {
  func.func @_dsconv_kernel(%arg0: i32, %arg1: memref<1x4x256xf32, #tpu.memory_space<vmem>>, %arg2: memref<9x4x256xf32, #tpu.memory_space<vmem>>, %arg3: memref<8x4xf32, #tpu.memory_space<vmem>>, %arg4: memref<8x1xf32, #tpu.memory_space<vmem>>, %arg5: memref<1x8x256xf32, #tpu.memory_space<vmem>>) attributes {dimension_semantics = [#tpu.dimension_semantics<parallel>], iteration_bounds = array<i64: 2>, scalar_prefetch = 0 : i64, scratch_operands = 0 : i64, tpu.core_type = #tpu.core_type<tc>, window_params = [{transform_indices = @transform_0, window_bounds = array<i64: 1, 4, 256>}, {pipeline_mode = #tpu.pipeline_mode<synchronous>, transform_indices = @transform_1, window_bounds = array<i64: 9, 4, 256>}, {pipeline_mode = #tpu.pipeline_mode<synchronous>, transform_indices = @transform_2, window_bounds = array<i64: 8, 4>}, {pipeline_mode = #tpu.pipeline_mode<synchronous>, transform_indices = @transform_3, window_bounds = array<i64: 8, 1>}, {transform_indices = @transform_4, window_bounds = array<i64: 1, 8, 256>}]} {
    %c0 = arith.constant 0 : index
    %c0_0 = arith.constant 0 : index
    %c0_1 = arith.constant 0 : index
    %0 = vector.load %arg1[%c0, %c0_0, %c0_1] : memref<1x4x256xf32, #tpu.memory_space<vmem>>, vector<1x4x256xf32>
    %1 = vector.shape_cast %0 : vector<1x4x256xf32> to vector<4x256xf32>
    %c17_i32 = arith.constant 17 : i32
    %2 = tpu.dynamic_rotate %1 by %c17_i32 dim 1 : vector<4x256xf32>, i32 -> vector<4x256xf32>
    %c0_2 = arith.constant 0 : index
    %c0_3 = arith.constant 0 : index
    %c0_4 = arith.constant 0 : index
    %3 = vector.load %arg2[%c0_2, %c0_3, %c0_4] : memref<9x4x256xf32, #tpu.memory_space<vmem>>, vector<1x4x256xf32>
    %4 = vector.shape_cast %3 : vector<1x4x256xf32> to vector<4x256xf32>
    %5 = arith.mulf %4, %2 : vector<4x256xf32>
    %c16_i32 = arith.constant 16 : i32
    %6 = tpu.dynamic_rotate %1 by %c16_i32 dim 1 : vector<4x256xf32>, i32 -> vector<4x256xf32>
    %c1 = arith.constant 1 : index
    %c0_5 = arith.constant 0 : index
    %c0_6 = arith.constant 0 : index
    %7 = vector.load %arg2[%c1, %c0_5, %c0_6] : memref<9x4x256xf32, #tpu.memory_space<vmem>>, vector<1x4x256xf32>
    %8 = vector.shape_cast %7 : vector<1x4x256xf32> to vector<4x256xf32>
    %9 = arith.mulf %8, %6 : vector<4x256xf32>
    %10 = arith.addf %5, %9 : vector<4x256xf32>
    %c15_i32 = arith.constant 15 : i32
    %11 = tpu.dynamic_rotate %1 by %c15_i32 dim 1 : vector<4x256xf32>, i32 -> vector<4x256xf32>
    %c2 = arith.constant 2 : index
    %c0_7 = arith.constant 0 : index
    %c0_8 = arith.constant 0 : index
    %12 = vector.load %arg2[%c2, %c0_7, %c0_8] : memref<9x4x256xf32, #tpu.memory_space<vmem>>, vector<1x4x256xf32>
    %13 = vector.shape_cast %12 : vector<1x4x256xf32> to vector<4x256xf32>
    %14 = arith.mulf %13, %11 : vector<4x256xf32>
    %15 = arith.addf %10, %14 : vector<4x256xf32>
    %c1_i32 = arith.constant 1 : i32
    %16 = tpu.dynamic_rotate %1 by %c1_i32 dim 1 : vector<4x256xf32>, i32 -> vector<4x256xf32>
    %c3 = arith.constant 3 : index
    %c0_9 = arith.constant 0 : index
    %c0_10 = arith.constant 0 : index
    %17 = vector.load %arg2[%c3, %c0_9, %c0_10] : memref<9x4x256xf32, #tpu.memory_space<vmem>>, vector<1x4x256xf32>
    %18 = vector.shape_cast %17 : vector<1x4x256xf32> to vector<4x256xf32>
    %19 = arith.mulf %18, %16 : vector<4x256xf32>
    %20 = arith.addf %15, %19 : vector<4x256xf32>
    %c4 = arith.constant 4 : index
    %c0_11 = arith.constant 0 : index
    %c0_12 = arith.constant 0 : index
    %21 = vector.load %arg2[%c4, %c0_11, %c0_12] : memref<9x4x256xf32, #tpu.memory_space<vmem>>, vector<1x4x256xf32>
    %22 = vector.shape_cast %21 : vector<1x4x256xf32> to vector<4x256xf32>
    %23 = arith.mulf %22, %1 : vector<4x256xf32>
    %24 = arith.addf %20, %23 : vector<4x256xf32>
    %c255_i32 = arith.constant 255 : i32
    %25 = tpu.dynamic_rotate %1 by %c255_i32 dim 1 : vector<4x256xf32>, i32 -> vector<4x256xf32>
    %c5 = arith.constant 5 : index
    %c0_13 = arith.constant 0 : index
    %c0_14 = arith.constant 0 : index
    %26 = vector.load %arg2[%c5, %c0_13, %c0_14] : memref<9x4x256xf32, #tpu.memory_space<vmem>>, vector<1x4x256xf32>
    %27 = vector.shape_cast %26 : vector<1x4x256xf32> to vector<4x256xf32>
    %28 = arith.mulf %27, %25 : vector<4x256xf32>
    %29 = arith.addf %24, %28 : vector<4x256xf32>
    %c241_i32 = arith.constant 241 : i32
    %30 = tpu.dynamic_rotate %1 by %c241_i32 dim 1 : vector<4x256xf32>, i32 -> vector<4x256xf32>
    %c6 = arith.constant 6 : index
    %c0_15 = arith.constant 0 : index
    %c0_16 = arith.constant 0 : index
    %31 = vector.load %arg2[%c6, %c0_15, %c0_16] : memref<9x4x256xf32, #tpu.memory_space<vmem>>, vector<1x4x256xf32>
    %32 = vector.shape_cast %31 : vector<1x4x256xf32> to vector<4x256xf32>
    %33 = arith.mulf %32, %30 : vector<4x256xf32>
    %34 = arith.addf %29, %33 : vector<4x256xf32>
    %c240_i32 = arith.constant 240 : i32
    %35 = tpu.dynamic_rotate %1 by %c240_i32 dim 1 : vector<4x256xf32>, i32 -> vector<4x256xf32>
    %c7 = arith.constant 7 : index
    %c0_17 = arith.constant 0 : index
    %c0_18 = arith.constant 0 : index
    %36 = vector.load %arg2[%c7, %c0_17, %c0_18] : memref<9x4x256xf32, #tpu.memory_space<vmem>>, vector<1x4x256xf32>
    %37 = vector.shape_cast %36 : vector<1x4x256xf32> to vector<4x256xf32>
    %38 = arith.mulf %37, %35 : vector<4x256xf32>
    %39 = arith.addf %34, %38 : vector<4x256xf32>
    %c239_i32 = arith.constant 239 : i32
    %40 = tpu.dynamic_rotate %1 by %c239_i32 dim 1 : vector<4x256xf32>, i32 -> vector<4x256xf32>
    %c8 = arith.constant 8 : index
    %c0_19 = arith.constant 0 : index
    %c0_20 = arith.constant 0 : index
    %41 = vector.load %arg2[%c8, %c0_19, %c0_20] : memref<9x4x256xf32, #tpu.memory_space<vmem>>, vector<1x4x256xf32>
    %42 = vector.shape_cast %41 : vector<1x4x256xf32> to vector<4x256xf32>
    %43 = arith.mulf %42, %40 : vector<4x256xf32>
    %44 = arith.addf %39, %43 : vector<4x256xf32>
    %c0_21 = arith.constant 0 : index
    %c0_22 = arith.constant 0 : index
    %45 = vector.load %arg3[%c0_21, %c0_22] : memref<8x4xf32, #tpu.memory_space<vmem>>, vector<8x4xf32>
    %cst = arith.constant dense<0.000000e+00> : vector<8x256xf32>
    %46 = tpu.matmul %45, %44, %cst {dimension_numbers = #tpu.dot_dimension_numbers<[1], [0], [0], [1], [0, 0, 1, 1], [], []>} : vector<8x4xf32>, vector<4x256xf32>, vector<8x256xf32> -> vector<8x256xf32>
    %c0_23 = arith.constant 0 : index
    %c0_24 = arith.constant 0 : index
    %47 = vector.load %arg4[%c0_23, %c0_24] : memref<8x1xf32, #tpu.memory_space<vmem>>, vector<8x1xf32>
    %48 = vector.broadcast %47 : vector<8x1xf32> to vector<8x256xf32>
    %49 = arith.addf %46, %48 : vector<8x256xf32>
    %c0_25 = arith.constant 0 : index
    %c0_26 = arith.constant 0 : index
    %c0_27 = arith.constant 0 : index
    %50 = vector.load %arg5[%c0_25, %c0_26, %c0_27] : memref<1x8x256xf32, #tpu.memory_space<vmem>>, vector<1x8x256xf32>
    %51 = vector.shape_cast %50 : vector<1x8x256xf32> to vector<8x256xf32>
    %52 = vector.shape_cast %49 : vector<8x256xf32> to vector<1x8x256xf32>
    tpu.vector_store %arg5[%c0_25, %c0_26, %c0_27], %52 {strides = array<i32>} : memref<1x8x256xf32, #tpu.memory_space<vmem>>, vector<1x8x256xf32>,
    return
  }
  func.func @transform_0(%arg0: i32) -> (i32, i32, i32) {
    %c0_i32 = arith.constant 0 : i32
    %c0_i32_0 = arith.constant 0 : i32
    %c0_i32_1 = arith.constant 0 : i32
    return %arg0, %c0_i32, %c0_i32_0 : i32, i32, i32
  }
  func.func @transform_1(%arg0: i32) -> (i32, i32, i32) {
    %c0_i32 = arith.constant 0 : i32
    %c0_i32_0 = arith.constant 0 : i32
    %c0_i32_1 = arith.constant 0 : i32
    %c0_i32_2 = arith.constant 0 : i32
    return %c0_i32, %c0_i32_0, %c0_i32_1 : i32, i32, i32
  }
  func.func @transform_2(%arg0: i32) -> (i32, i32) {
    %c0_i32 = arith.constant 0 : i32
    %c0_i32_0 = arith.constant 0 : i32
    %c0_i32_1 = arith.constant 0 : i32
    return %c0_i32, %c0_i32_0 : i32, i32
  }
  func.func @transform_3(%arg0: i32) -> (i32, i32) {
    %c0_i32 = arith.constant 0 : i32
    %c0_i32_0 = arith.constant 0 : i32
    %c0_i32_1 = arith.constant 0 : i32
    return %c0_i32, %c0_i32_0 : i32, i32
  }
  func.func @transform_4(%arg0: i32) -> (i32, i32, i32) {
    %c0_i32 = arith.constant 0 : i32
    %c0_i32_0 = arith.constant 0 : i32
    %c0_i32_1 = arith.constant 0 : i32
    return %arg0, %c0_i32, %c0_i32_0 : i32, i32, i32
  }
}

</mosaic_0001>

<bundles_post_ra>
// kernel: tpu_custom_call.1
= control target key start
LH: loop header
LB: loop body
LE: loop exit
PB: predicated region body
PF: predicated region fallthrough
CT: control target
= control target key end

     0   :  { %9 = vsyncpa [#allocation3], 0  ;;  %s898_s0 = inlined_call_operand.vmem [shape: f32[2,4,256], index: 0, kind: input, shape index: {}]   ;;  %s899_s1 = inlined_call_operand.hbm [shape: f32[9,4,256], index: 1, kind: input, shape index: {}]   ;;  %s900_s2 = inlined_call_operand.vmem [shape: f32[8,4], index: 2, kind: input, shape index: {}]   ;;  %s901_s3 = inlined_call_operand.vmem [shape: f32[8,1], index: 3, kind: input, shape index: {}]   ;;  %s902_s4 = inlined_call_operand.hbm [shape: f32[2,8,256], index: 4, kind: output, shape index: {}]  }
   0x1   :  { %10 = vsyncpa [#allocation4], 0 }
   0x2   :  { %12 = vsyncpa [#allocation4 + $0x1], 0  ;;  %s734_s15 = smov 0   ;;  %s736_s16 = smov 0  }
   0x3   :  { %s738_s17 = smov 0   ;;  %s740_s18 = smov 0  }
   0x4 LB: > { %s755_s19 = sadd.s32 4294967295, %s693_s18   ;;  %s516_s20 = sadd.s32 4294967294, %s693_s18   ;;  %s693_s18 = sphi %s740_s18, %s918_s18   ;;  %s689_s17 = sphi %s738_s17, %s917_s17   ;;  %s685_s16 = sphi %s736_s16, %s916_s16   ;;  %s681_s15 = sphi %s734_s15, %s915_s15  }
   0x5   : > { %s759_s21 = sadd.s32 1, %s693_s18   ;;  %s114_s22 = sadd.s32 1, %s689_s17 }
   0x6   : > { %s111_s23 = ssub.s32 %s693_s18, %s759_s21  ;;  %p124_p0 = scmp.ne.s32.totalorder %s689_s17, %s685_s16 }
   0x7   : > { %p112_p1 = scmp.eq.s32.totalorder %s111_s23, 0  ;;  %p125_p2 = scmp.eq.s32.totalorder %s755_s19, 1 }
   0x8   : > { %p130_p3 = scmp.ne.s32.totalorder %s685_s16, %s681_s15  ;;  %p131_p4 = scmp.eq.s32.totalorder %s516_s20, 1 }
   0x9   : > { %s770_s24 = scalar_select %p112_p1, %s689_s17, %s114_s22  }
   0xa   : > { %p772_p5 = por %p125_p2, %p124_p0  ;;  %p776_p6 = por %p131_p4, %p130_p3 }
   0xb   : > { %p517_p7 = scmp.ge.s32.totalorder %s693_s18, 1  ;;  %p138_p8 = scmp.lt.s32.totalorder %s693_s18, 3 }
   0xc   : > { %s906_s25 = scalar_select %p772_p5, 1, 0 }
   0xd   : > { %s907_s26 = scalar_select %p776_p6, 1, 0 }
   0xe   : > { %p903_p9 = scmp.eq.s32.totalorder %s755_s19, 0  ;;  %p783_p10 = pnand %p517_p7, %p138_p8 }
   0xf   : > { %s695_s28 = smov [#allocation2]   ;;  %s599_s7 = scalar_lea.hbm %s899_s1, 1152 }
  0x10   : > { %s908_s27 = scalar_select %p783_p10, 1, 0 }
  0x11   : > { %s150_s29 = sshll.u32 %s695_s28, 4  ;;  %p541_p11 = pneg %p783_p10  ;;  %s151_s29 = int_to_ptr.vmem [resolvable:$true] %s150_s29 }
  0x12   : > { %p600_p13 = scmp.ne.s32.totalorder %s899_s1, %s599_s7  ;;  %p606_p3 = scmp.lt.u32.totalorder %s599_s7, %s899_s1 }
  0x13   : > { %p791_p12 = pnand %p903_p9, %p541_p11 }
  0x15   : > { %p601_p0 = pneg %p791_p12 }
  0x17   : > { %p602_p1 = pnand %p601_p0, %p600_p13 }
  0x19   : > { %p603_p2 = pneg %p602_p1 }
  0x1b   : > { %p608_p4 = pnand %p606_p3, %p603_p2 }
  0x1d   : > { %611 = shalt.err (!%p608_p4)
}
  0x1e   : > { %s612_s12 = scalar_lea.vmem %s151_s29, 1152  ;;  %p620_p9 = scmp.lt.s32.totalorder %s151_s29, %s151_s29 }
  0x1f   : > { %p613_p7 = scmp.ne.s32.totalorder %s151_s29, %s612_s12  ;;  %p621_p6 = scmp.lt.s32.totalorder %s612_s12, %s612_s12 }
  0x21   : > { %p615_p8 = pnand %p613_p7, %p601_p0  ;;  %p622_p5 = por %p621_p6, %p620_p9 }
  0x23   : > { %p616_p11 = pneg %p615_p8 }
  0x25   : > { %p623_p10 = pnand %p622_p5, %p616_p11 }
  0x27   : > { %626 = shalt.err (!%p623_p10)
}
  0x28   : > { %s696_s13 = smov 128   ;;  %s697_s14 = smov 8  }
  0x29   : > { %544 = dma.hbm_to_vmem [thread:$0]  (!%p791_p12), %s899_s1, 1152, %s151_s29, [#allocation3], %s696_s13, %s696_s13, %s697_s14  }
  0x2a   : > { %p910_p13 = scmp.ne.s32.totalorder %s908_s27, 0 }
  0x2b   : > { %p911_p1 = scmp.eq.s32.totalorder (!%p910_p13), %s755_s19, 0 }
  0x2c   : > { %180 = sbr.rel (%p910_p13) target bundleno = 442 (0x1ba), region = 36 }
  0x33   : > { %672 = dma.done.wait (%p911_p1), [#allocation3], 1152   ;;  %p912_p0 = pmov %p911_p1 }
  0x34   : > { %p206_p5 = scmp.lt.s32.totalorder %s755_s19, 1  ;;  %s698_s29 = smov 16   ;;  %v705_v2 = vmov 0.0   ;;  %v706_v3 = vmov 0   ;;  %v340_v4 = vld [vmem:[%s901_s3] sm:$0xff]  ;;  %v219_v5 = vlaneseq  ;;  %v238_v16 = vld [vmem:[#allocation2 + $0x8] sm:$0xff] }
  0x35   : > { %674 = vsyncadd (%p912_p0), [#allocation3], 4294966144  ;;  %s699_s27 = smov 17   ;;  %s700_s7 = smov 15   ;;  %421 = vmatprep.mubr.f32.mxu0 %v705_v2  ;;  %597 = vset.pattern.permute.xlu0 %v706_v3  ;;  %v224_v19 = vld [vmem:[#allocation2] sm:$0xff]  ;;  %v253_v24 = vld [vmem:[#allocation2 + $0x10] sm:$0xff] }
  0x36   : > { %s207_s23 = scalar_select %p206_p5, %s755_s19, 1  ;;  %v837_v6 = vand.u32 127, %v219_v5  ;;  %v268_v29 = vld [vmem:[#allocation2 + $0x18] sm:$0xff]  ;;  %v276_v39 = vld [vmem:[#allocation2 + $0x20] sm:$0xff]  ;;  %v287_v47 = vld [vmem:[#allocation2 + $0x28] sm:$0xff]  ;;  %vm352_vm8 = vcmask 1043456  }
  0x37   : > { %s701_s8 = smov 1   ;;  %s702_s9 = smov 127   ;;  %v302_v51 = vld [vmem:[#allocation2 + $0x30] sm:$0xff]  ;;  %v317_v56 = vld [vmem:[#allocation2 + $0x38] sm:$0xff]  ;;  %vm348_vm9 = vcmask 31744  }
  0x38   : > { %s533_s28 = sshll.u32 %s207_s23, 3  ;;  %s703_s10 = smov 113   ;;  %vm234_vm0 = vcmp.lt.s32.totalorder %v837_v6, 16  ;;  %vm249_vm1 = vcmp.lt.s32.totalorder %v837_v6, 15  ;;  %vm221_vm2 = vcmp.lt.s32.totalorder %v837_v6, 17  ;;  %vm264_vm3 = vcmp.lt.s32.totalorder %v837_v6, 1 }
  0x39   : > { %s210_s6 = scalar_lea.vmem %s898_s0, %s533_s28  ;;  %s704_s11 = smov 112   ;;  %vm283_vm4 = vcmp.lt.s32.totalorder %v837_v6, 127  ;;  %vm298_vm5 = vcmp.lt.s32.totalorder %v837_v6, 113  ;;  %vm313_vm6 = vcmp.lt.s32.totalorder %v837_v6, 112  ;;  %vm328_vm7 = vcmp.lt.s32.totalorder %v837_v6, 111  ;;  %v339_v6 = vld [vmem:[%s900_s2] sm:$0xff] }
  0x3a   : > { %v822_v0 = vld [vmem:[%s210_s6] sm:$0xff]  ;;  %s707_s12 = smov 111   ;;  %s203_s23 = sand.u32 1, %s685_s16  }
  0x3b   : > { %230 = vrot.lane.b32.xlu1 %v822_v0, %s698_s29  ;;  %215 = vrot.lane.b32.xlu0 %v822_v0, %s699_s27  ;;  %v213_v1 = vcombine.high %v822_v0, %v822_v0  ;;  %v277_v43 = vmul.f32 %v276_v39, %v822_v0  ;;  %s522_s28 = sshll.u32 %s203_s23, 4  ;;  %s534_s5 = sshll.u32 %s755_s19, 8 }
  0x3c   : > { %s205_s30 = scalar_lea.vmem [#allocation5], %s522_s28  ;;  %p913_p9 = scmp.ne.s32.totalorder %s906_s25, 0 }
  0x3d   : > { %s445_s6 = sshll.u32 %s205_s30, 4  ;;  %s858_s6 = int_to_ptr.vmem [resolvable:$true] %s445_s6 }
  0x3e   : > { %s627_s19 = scalar_lea.vmem %s858_s6, 256 }
  0x3f   : > { %245 = vrot.lane.b32.xlu0 %v822_v0, %s700_s7  ;;  %232 = vrot.lane.b32.xlu1 %v213_v1, %s698_s29  ;;  %p628_p6 = scmp.ne.s32.totalorder %s858_s6, %s627_s19 }
  0x41   : > { %p629_p10 = pnand %p628_p6, %p913_p9 }
  0x43   : > { %247 = vrot.lane.b32.xlu1 %v213_v1, %s700_s7  ;;  %217 = vrot.lane.b32.xlu0 %v213_v1, %s699_s27  ;;  %s856_s7 = scalar_lea.hbm %s902_s4, %s534_s5  ;;  %p630_p12 = pneg %p629_p10 }
  0x47   : > { %262 = vrot.lane.b32.xlu1 %v213_v1, %s701_s8  ;;  %260 = vrot.lane.b32.xlu0 %v822_v0, %s701_s8  ;;  %s431_s8 = scalar_lea.sflag [#allocation4], %s203_s23 }
  0x4b   : > { %281 = vrot.lane.b32.xlu1 %v213_v1, %s702_s9  ;;  %279 = vrot.lane.b32.xlu0 %v822_v0, %s702_s9  ;;  %s708_s9 = smov [#allocation5]  }
  0x4f   : > { %296 = vrot.lane.b32.xlu1 %v213_v1, %s703_s10  ;;  %294 = vrot.lane.b32.xlu0 %v822_v0, %s703_s10  ;;  %s631_s10 = sshll.u32 %s708_s9, 4  ;;  %s632_s10 = int_to_ptr.vmem [resolvable:$false] %s631_s10 }
  0x50   : > { %p634_p2 = scmp.lt.s32.totalorder %s858_s6, %s632_s10 }
  0x53   : > { %311 = vrot.lane.b32.xlu1 %v213_v1, %s704_s11  ;;  %309 = vrot.lane.b32.xlu0 %v822_v0, %s704_s11  ;;  %s633_s11 = scalar_lea.vmem %s632_s10, 512 }
  0x54   : > { %p635_p3 = scmp.lt.s32.totalorder %s633_s11, %s627_s19 }
  0x56   : > { %p636_p4 = por %p635_p3, %p634_p2 }
  0x57   : > { %326 = vrot.lane.b32.xlu1 %v213_v1, %s707_s12  ;;  %324 = vrot.lane.b32.xlu0 %v822_v0, %s707_s12  ;;  %v332_v1 = vld [vmem:[#allocation2 + $0x40] sm:$0xff] }
  0x58   : > { %p637_p7 = pnand %p636_p4, %p630_p12 }
  0x5b   : > { %343 = vperm.xlu0 %597, %v340_v4  }
  0xad   : > { %v231_v7 = vpop.permute.xlu1 %230  ;;  %v216_v8 = vpop.permute.xlu0 %215 }
  0xb1   : > { %v246_v9 = vpop.permute.xlu0 %245  ;;  %v233_v10 = vpop.permute.xlu1 %232 }
  0xb2   : > { %v235_v11 = vsel %vm234_vm0, %v231_v7, %v233_v10  ;;  %v236_v12 = vsel %vm234_vm0, %v233_v10, %v231_v7 }
  0xb3   : > { %v241_v13 = vcombine.low %v236_v12, %v235_v11 }
  0xb5   : > { %v248_v14 = vpop.permute.xlu1 %247  ;;  %v218_v15 = vpop.permute.xlu0 %217  ;;  %v243_v25 = vmul.f32 %v241_v13, %v238_v16 }
  0xb6   : > { %v250_v17 = vsel %vm249_vm1, %v246_v9, %v248_v14  ;;  %v251_v18 = vsel %vm249_vm1, %v248_v14, %v246_v9  ;;  %v222_v20 = vsel %vm221_vm2, %v216_v8, %v218_v15  ;;  %v223_v21 = vsel %vm221_vm2, %v218_v15, %v216_v8 }
  0xb7   : > { %v256_v22 = vcombine.low %v251_v18, %v250_v17  ;;  %v227_v23 = vcombine.low %v223_v21, %v222_v20 }
  0xb9   : > { %v229_v26 = vmul.f32 %v227_v23, %v224_v19  ;;  %v263_v27 = vpop.permute.xlu1 %262  ;;  %v261_v28 = vpop.permute.xlu0 %260  ;;  %v258_v32 = vmul.f32 %v256_v22, %v253_v24 }
  0xba   : > { %v265_v30 = vsel %vm264_vm3, %v261_v28, %v263_v27  ;;  %v266_v31 = vsel %vm264_vm3, %v263_v27, %v261_v28 }
  0xbb   : > { %v244_v33 = vadd.f32 %v243_v25, %v229_v26  ;;  %v271_v34 = vcombine.low %v266_v31, %v265_v30 }
  0xbd   : > { %v259_v35 = vadd.f32 %v258_v32, %v244_v33  ;;  %v273_v36 = vmul.f32 %v271_v34, %v268_v29  ;;  %v282_v37 = vpop.permute.xlu1 %281  ;;  %v280_v38 = vpop.permute.xlu0 %279 }
  0xbe   : > { %v284_v40 = vsel %vm283_vm4, %v280_v38, %v282_v37  ;;  %v285_v41 = vsel %vm283_vm4, %v282_v37, %v280_v38 }
  0xbf   : > { %v274_v42 = vadd.f32 %v273_v36, %v259_v35  ;;  %v290_v44 = vcombine.low %v284_v40, %v285_v41 }
  0xc1   : > { %v297_v45 = vpop.permute.xlu1 %296  ;;  %v295_v46 = vpop.permute.xlu0 %294  ;;  %v278_v52 = vadd.f32 %v277_v43, %v274_v42  ;;  %v292_v53 = vmul.f32 %v290_v44, %v287_v47 }
  0xc2   : > { %v299_v48 = vsel %vm298_vm5, %v295_v46, %v297_v45  ;;  %v300_v49 = vsel %vm298_vm5, %v297_v45, %v295_v46 }
  0xc3   : > { %v305_v50 = vcombine.low %v299_v48, %v300_v49  ;;  %v293_v61 = vadd.f32 %v292_v53, %v278_v52 }
  0xc5   : > { %v312_v54 = vpop.permute.xlu1 %311  ;;  %v310_v55 = vpop.permute.xlu0 %309  ;;  %v307_v59 = vmul.f32 %v305_v50, %v302_v51 }
  0xc6   : > { %v314_v57 = vsel %vm313_vm6, %v310_v55, %v312_v54  ;;  %v315_v58 = vsel %vm313_vm6, %v312_v54, %v310_v55 }
  0xc7   : > { %v320_v60 = vcombine.low %v314_v57, %v315_v58  ;;  %v308_v4 = vadd.f32 %v307_v59, %v293_v61 }
  0xc9   : > { %v322_v62 = vmul.f32 %v320_v60, %v317_v56  ;;  %v327_v63 = vpop.permute.xlu1 %326  ;;  %v325_v0 = vpop.permute.xlu0 %324 }
  0xca   : > { %v329_v2 = vsel %vm328_vm7, %v325_v0, %v327_v63  ;;  %v330_v3 = vsel %vm328_vm7, %v327_v63, %v325_v0 }
  0xcb   : > { %v335_v5 = vcombine.low %v329_v2, %v330_v3  ;;  %v323_v8 = vadd.f32 %v322_v62, %v308_v4 }
  0xcd   : > { %v337_v7 = vmul.f32 %v335_v5, %v332_v1 }
  0xcf   : > { %v338_v9 = vadd.f32 %v337_v7, %v323_v8 }
  0xd1   : > { %v347_v10 = vcombine.high %v338_v9, %v338_v9 }
  0xd3   : > { %525 = vmatprep.subr.msk.mxu0 %vm352_vm8, %v347_v10 }
  0xd4   : > { %526 = vmatpush1.msk.msra.mxu0 %vm352_vm8, %v338_v9 }
  0xd5   : > { %527 = vmatmul.mubr.msk.f32.vlgmr.msra.gmra.mrb[0].mxu0 %vm348_vm9, %v339_v6 }
  0xda   : > { %v344_v11 = vpop.permute.xlu0 %343 }
 0x1a8   : > { %v423_v12 = vpop.f32.mrb[0].mxu0 }
 0x1a9   : > { %v424_v13 = vadd.f32 %v423_v12, %v344_v11  ;;  %v425_v14 = vpop.f32.mrb[1].mxu0 }
 0x1aa   : > { %v426_v15 = vadd.f32 %v425_v14, %v344_v11 }
 0x1ab   : > { %428 = vst [vmem:[%s205_s30] sm:$0xff] %v424_v13 }
 0x1ac   : > { %429 = vst [vmem:[%s205_s30 + $0x8] sm:$0xff] %v426_v15 }
 0x1ad   : > { %640 = shalt.err (!%p637_p7)
}
 0x1ae   : > { %s641_s12 = scalar_lea.hbm %s856_s7, 256  ;;  %s645_s20 = scalar_lea.hbm %s902_s4, 512 }
 0x1af   : > { %p642_p8 = scmp.ne.s32.totalorder %s856_s7, %s641_s12  ;;  %p646_p1 = scmp.lt.u32.totalorder %s856_s7, %s902_s4 }
 0x1b0   : > { %p647_p0 = scmp.lt.u32.totalorder %s645_s20, %s641_s12  ;;  %p649_p6 = scmp.lt.u32.totalorder %s641_s12, %s856_s7 }
 0x1b1   : > { %p643_p11 = pnand %p642_p8, %p913_p9 }
 0x1b2   : > { %p648_p5 = por %p647_p0, %p646_p1 }
 0x1b3   : > { %p644_p13 = pneg %p643_p11 }
 0x1b4   : > { %p650_p10 = por %p649_p6, %p648_p5 }
 0x1b6   : > { %p651_p12 = pnand %p650_p10, %p644_p13 }
 0x1b8   : > { %654 = shalt.err (!%p651_p12)
}
 0x1b9   : > { %539 = dma.vmem_to_hbm [thread:$0]  (%p913_p9), %s858_s6, 256, %s856_s7, %s431_s8  }
 0x1ba PF: > { %p551_p2 = scmp.ge.s32.totalorder %s693_s18, 2  ;;  %s457_s28 = sand.u32 1, %s681_s15  }
 0x1bb   : > { %p914_p3 = scmp.ne.s32.totalorder %s907_s26, 0  ;;  %s458_s5 = scalar_lea.sflag [#allocation4], %s457_s28 }
 0x1bd   : > { %p546_p4 = pnand %p551_p2, %p914_p3 }
 0x1bf   : > { %676 = dma.done.wait (!%p546_p4), %s458_s5, 256  }
 0x1c0   : > { %678 = vsyncadd (!%p546_p4), %s458_s5, 4294967040  ;;  %p15_p7 = scmp.ge.s32.totalorder %s759_s21, 4   ;;  %s915_s15 = smov %s685_s16 }
 0x1c1   : > { %s916_s16 = smov %s689_s17  ;;  %s917_s17 = smov %s770_s24 }
 0x1c2   : > { %s918_s18 = smov %s759_s21  ;;  %17 = sbr.rel (!%p15_p7) target bundleno = 4 (0x4), region = 84 }
 0x1c9   :  { %463 = vsyncpa [#allocation3], 1 }
 0x1ca   :  { %465 = vsyncpa [#allocation3 + $0x1], 1 }
 0x1cb   :  { %466 = vsyncpa [#allocation4], 1 }
 0x1cc   :  { %468 = vsyncpa [#allocation4 + $0x1], 1 }

</bundles_post_ra>
